<compile_context>
chip_gen: v6e
topology: v6e:2x2x1
jax: 0.10.0
libtpu: 0.0.40
codegen_flags: <defaults>
</compile_context>

<pallas_src>
import functools

import jax
import jax.numpy as jnp
import numpy as np
from jax.experimental import pallas as pl
from jax.experimental.pallas import tpu as pltpu

N_LANDMARKS = 68
FLAT = 2 * N_LANDMARKS          # 136 columns, interleaved (x0, y0, ..., x67, y67)
NUM_CORES = 2                   # v7x has 2 TensorCores; harmless on v5e/v6e


def _round_up(x, m):
    return ((x + m - 1) // m) * m


def _nmse_kernel(w_ref, inp_ref, tgt_ref, out_ref, acc_ref, *, batch, weight):
    c = pl.program_id(0)
    j = pl.program_id(1)
    nj = pl.num_programs(1)
    tb = inp_ref.shape[0]

    @pl.when(j == 0)
    def _():
        acc_ref[...] = jnp.zeros_like(acc_ref)

    inp = inp_ref[...].astype(jnp.float32)          # (TB, 136)
    tgt = tgt_ref[...].astype(jnp.float32)          # (TB, 136)
    wx = w_ref[0:1, :]                              # (1, 136)  {+1, -1, 0}
    wy = w_ref[1:2, :]                              # (1, 136)

    # ---- per-sample squared L2 distance over all 136 coords ----
    diff = tgt - inp
    sq_dist = jnp.sum(diff * diff, axis=-1, keepdims=True)          # (TB, 1)

    # ---- pupil-distance normalizer via signed-weight centroid deltas ----
    dx = jnp.sum(tgt * wx, axis=-1, keepdims=True) * (1.0 / 6.0)    # (TB, 1)
    dy = jnp.sum(tgt * wy, axis=-1, keepdims=True) * (1.0 / 6.0)    # (TB, 1)
    inv_dio = jax.lax.rsqrt(dx * dx + dy * dy)                      # EUP rsqrt

    per_sample = sq_dist * inv_dio * (1.0 / float(N_LANDMARKS))     # (TB, 1)

    # mask rows past the true batch (partial tile / out-of-range chunk on this core)
    base = (c * nj + j) * tb
    row = base + jax.lax.broadcasted_iota(jnp.int32, (tb, 1), 0)
    per_sample = jnp.where(row < batch, per_sample, 0.0)

    acc_ref[...] += jnp.sum(per_sample, axis=0, keepdims=True)      # (1, 1)

    @pl.when(j == nj - 1)
    def _():
        out_ref[...] = jnp.reshape(
            acc_ref[...] * (weight / float(batch)), (1, 1, 1)
        ).astype(out_ref.dtype)


def nmse_loss(pred, target, *, weight=1.0, tile=2048):
    """pred, target: (B, 68, 2)  ->  scalar float32 loss."""
    assert pred.shape == target.shape
    assert pred.shape[-2:] == (N_LANDMARKS, 2)
    b = pred.shape[0]
    pred_f = pred.reshape(b, FLAT)      # native dtype; cast to f32 happens in-kernel
    tgt_f = target.reshape(b, FLAT)

    tb = max(8, min(_round_up(tile, 8), _round_up(b, 8)))
    num_chunks = pl.cdiv(b, tb)
    j_per_core = pl.cdiv(num_chunks, NUM_CORES)

    # signed weights for the pupil-distance centroid delta (left eye +, right eye -)
    wxy = np.zeros((2, FLAT), np.float32)
    wxy[0, 2 * np.arange(36, 42)] = 1.0
    wxy[0, 2 * np.arange(42, 48)] = -1.0
    wxy[1, 2 * np.arange(36, 42) + 1] = 1.0
    wxy[1, 2 * np.arange(42, 48) + 1] = -1.0
    wxy = jnp.asarray(wxy)

    def chunk_map(c, j):
        # Clamp: out-of-range chunks (fully masked to zero in-kernel) never DMA out of bounds.
        return (jnp.minimum(c * j_per_core + j, num_chunks - 1), 0)

    kernel = functools.partial(_nmse_kernel, batch=b, weight=float(weight))

    partial_sums = pl.pallas_call(
        kernel,
        out_shape=jax.ShapeDtypeStruct((NUM_CORES, 1, 1), jnp.float32),
        grid=(NUM_CORES, j_per_core),
        in_specs=[
            pl.BlockSpec((2, FLAT), lambda c, j: (0, 0)),      # constant signed weights
            pl.BlockSpec((tb, FLAT), chunk_map),               # pred chunk
            pl.BlockSpec((tb, FLAT), chunk_map),               # target chunk
        ],
        out_specs=pl.BlockSpec((1, 1, 1), lambda c, j: (c, 0, 0)),
        scratch_shapes=[pltpu.VMEM((1, 1), jnp.float32)],
        compiler_params=pltpu.CompilerParams(
            dimension_semantics=("parallel", "arbitrary")),
    )(wxy, pred_f, tgt_f)

    return jnp.sum(partial_sums)


def _nmse_ref(pred, target, weight=1.0):
    """Pure-JAX reference mirroring the PyTorch forward."""
    b = pred.shape[0]
    left = jnp.mean(target[..., 36:42, :], axis=-2)
    right = jnp.mean(target[..., 42:48, :], axis=-2)
    dio = jnp.linalg.norm(left - right, axis=-1)
    distances = jnp.linalg.norm(
        target.reshape(b, FLAT) - pred.reshape(b, FLAT), axis=-1) ** 2
    return weight * jnp.mean(distances / dio / N_LANDMARKS)


if __name__ == "__main__":
    key = jax.random.PRNGKey(0)
    k1, k2, k3, k4 = jax.random.split(key, 4)

    # small case consistent with the module: (B, 68, 2) landmarks
    b1 = 2
    pred1 = jax.random.normal(k1, (b1, N_LANDMARKS, 2), dtype=jnp.float32)
    tgt1 = jax.random.normal(k2, (b1, N_LANDMARKS, 2), dtype=jnp.float32)
    loss1 = nmse_loss(pred1, tgt1)
    jax.block_until_ready(loss1)
    ref1 = _nmse_ref(pred1, tgt1)
    assert jnp.allclose(loss1, ref1, rtol=1e-5, atol=1e-5), (loss1, ref1)

    # exercise multi-chunk accumulation, partial tiles and the 2-core split
    b2 = 50
    pred2 = jax.random.normal(k3, (b2, N_LANDMARKS, 2), dtype=jnp.float32)
    tgt2 = jax.random.normal(k4, (b2, N_LANDMARKS, 2), dtype=jnp.float32)
    loss2 = nmse_loss(pred2, tgt2, tile=8)
    jax.block_until_ready(loss2)
    ref2 = _nmse_ref(pred2, tgt2)
    assert jnp.allclose(loss2, ref2, rtol=1e-5, atol=1e-5), (loss2, ref2)

    print("KERNEL_OK")
</pallas_src>

<mosaic_0001>
module attributes {stable_mosaic.version = 11 : i64} {
  func.func @_nmse_kernel(%arg0: i32, %arg1: i32, %arg2: memref<2x136xf32, #tpu.memory_space<vmem>>, %arg3: memref<8x136xf32, #tpu.memory_space<vmem>>, %arg4: memref<8x136xf32, #tpu.memory_space<vmem>>, %arg5: memref<1x1x1xf32, #tpu.memory_space<vmem>>, %arg6: memref<1x1xf32, #tpu.memory_space<vmem>>) attributes {dimension_semantics = [#tpu.dimension_semantics<parallel>, #tpu.dimension_semantics<arbitrary>], iteration_bounds = array<i64: 2, 1>, scalar_prefetch = 0 : i64, scratch_operands = 1 : i64, tpu.core_type = #tpu.core_type<tc>, window_params = [{pipeline_mode = #tpu.pipeline_mode<synchronous>, transform_indices = @transform_0, window_bounds = array<i64: 2, 136>}, {transform_indices = @transform_1, window_bounds = array<i64: 8, 136>}, {transform_indices = @transform_2, window_bounds = array<i64: 8, 136>}, {transform_indices = @transform_3, window_bounds = array<i64: 1, 1, 1>}]} {
    %c0_i32 = arith.constant 0 : i32
    %0 = arith.cmpi eq, %arg1, %c0_i32 : i32
    %1 = arith.extui %0 : i1 to i32
    %c0_i32_0 = arith.constant 0 : i32
    %2 = arith.cmpi ne, %1, %c0_i32_0 : i32
    scf.if %2 {
      %cst_20 = arith.constant 0.000000e+00 : f32
      %48 = vector.broadcast %cst_20 : f32 to vector<1x1xf32>
      %c0_21 = arith.constant 0 : index
      %c0_22 = arith.constant 0 : index
      %49 = vector.load %arg6[%c0_21, %c0_22] : memref<1x1xf32, #tpu.memory_space<vmem>>, vector<1x1xf32>
      tpu.vector_store %arg6[%c0_21, %c0_22], %48 {strides = array<i32>} : memref<1x1xf32, #tpu.memory_space<vmem>>, vector<1x1xf32>,
    } else {
    }
    %c0 = arith.constant 0 : index
    %c0_1 = arith.constant 0 : index
    %3 = vector.load %arg3[%c0, %c0_1] : memref<8x136xf32, #tpu.memory_space<vmem>>, vector<8x136xf32>
    %c0_2 = arith.constant 0 : index
    %c0_3 = arith.constant 0 : index
    %4 = vector.load %arg4[%c0_2, %c0_3] : memref<8x136xf32, #tpu.memory_space<vmem>>, vector<8x136xf32>
    %c0_4 = arith.constant 0 : index
    %c0_5 = arith.constant 0 : index
    %5 = vector.load %arg2[%c0_4, %c0_5] : memref<2x136xf32, #tpu.memory_space<vmem>>, vector<1x136xf32>
    %c1 = arith.constant 1 : index
    %c0_6 = arith.constant 0 : index
    %6 = vector.load %arg2[%c1, %c0_6] : memref<2x136xf32, #tpu.memory_space<vmem>>, vector<1x136xf32>
    %7 = arith.subf %4, %3 : vector<8x136xf32>
    %8 = arith.mulf %7, %7 : vector<8x136xf32>
    %cst = arith.constant dense<0.000000e+00> : vector<8xf32>
    %9 = vector.multi_reduction <add>, %8, %cst [1] : vector<8x136xf32> to vector<8xf32>
    %10 = vector.shape_cast %9 : vector<8xf32> to vector<8x1xf32>
    %11 = vector.broadcast %5 : vector<1x136xf32> to vector<8x136xf32>
    %12 = arith.mulf %4, %11 : vector<8x136xf32>
    %cst_7 = arith.constant dense<0.000000e+00> : vector<8xf32>
    %13 = vector.multi_reduction <add>, %12, %cst_7 [1] : vector<8x136xf32> to vector<8xf32>
    %14 = vector.shape_cast %13 : vector<8xf32> to vector<8x1xf32>
    %cst_8 = arith.constant 0.166666672 : f32
    %15 = vector.broadcast %cst_8 : f32 to vector<8x1xf32>
    %16 = arith.mulf %14, %15 : vector<8x1xf32>
    %17 = vector.broadcast %6 : vector<1x136xf32> to vector<8x136xf32>
    %18 = arith.mulf %4, %17 : vector<8x136xf32>
    %cst_9 = arith.constant dense<0.000000e+00> : vector<8xf32>
    %19 = vector.multi_reduction <add>, %18, %cst_9 [1] : vector<8x136xf32> to vector<8xf32>
    %20 = vector.shape_cast %19 : vector<8xf32> to vector<8x1xf32>
    %cst_10 = arith.constant 0.166666672 : f32
    %21 = vector.broadcast %cst_10 : f32 to vector<8x1xf32>
    %22 = arith.mulf %20, %21 : vector<8x1xf32>
    %23 = arith.mulf %16, %16 : vector<8x1xf32>
    %24 = arith.mulf %22, %22 : vector<8x1xf32>
    %25 = arith.addf %23, %24 : vector<8x1xf32>
    %26 = math.rsqrt %25 : vector<8x1xf32>
    %27 = arith.mulf %10, %26 : vector<8x1xf32>
    %cst_11 = arith.constant 0.0147058824 : f32
    %28 = vector.broadcast %cst_11 : f32 to vector<8x1xf32>
    %29 = arith.mulf %27, %28 : vector<8x1xf32>
    %c1_i32 = arith.constant 1 : i32
    %30 = arith.muli %arg0, %c1_i32 : i32
    %31 = arith.addi %30, %arg1 : i32
    %c8_i32 = arith.constant 8 : i32
    %32 = arith.muli %31, %c8_i32 : i32
    %33 = tpu.iota {dimensions = array<i32: 0>} : vector<8x1xi32>
    %34 = vector.broadcast %32 : i32 to vector<8x1xi32>
    %35 = arith.addi %34, %33 : vector<8x1xi32>
    %c2_i32 = arith.constant 2 : i32
    %36 = vector.broadcast %c2_i32 : i32 to vector<8x1xi32>
    %37 = arith.cmpi slt, %35, %36 : vector<8x1xi32>
    %cst_12 = arith.constant 0.000000e+00 : f32
    %38 = vector.broadcast %cst_12 : f32 to vector<8x1xf32>
    %39 = arith.select %37, %29, %38 : vector<8x1xi1>, vector<8x1xf32>
    %c0_13 = arith.constant 0 : index
    %c0_14 = arith.constant 0 : index
    %40 = vector.load %arg6[%c0_13, %c0_14] : memref<1x1xf32, #tpu.memory_space<vmem>>, vector<1x1xf32>
    %cst_15 = arith.constant dense<0.000000e+00> : vector<1xf32>
    %41 = vector.multi_reduction <add>, %39, %cst_15 [0] : vector<8x1xf32> to vector<1xf32>
    %42 = vector.shape_cast %41 : vector<1xf32> to vector<1x1xf32>
    %43 = arith.addf %40, %42 : vector<1x1xf32>
    %c0_16 = arith.constant 0 : index
    %c0_17 = arith.constant 0 : index
    %44 = vector.load %arg6[%c0_16, %c0_17] : memref<1x1xf32, #tpu.memory_space<vmem>>, vector<1x1xf32>
    tpu.vector_store %arg6[%c0_16, %c0_17], %43 {strides = array<i32>} : memref<1x1xf32, #tpu.memory_space<vmem>>, vector<1x1xf32>,
    %c0_i32_18 = arith.constant 0 : i32
    %45 = arith.cmpi eq, %arg1, %c0_i32_18 : i32
    %46 = arith.extui %45 : i1 to i32
    %c0_i32_19 = arith.constant 0 : i32
    %47 = arith.cmpi ne, %46, %c0_i32_19 : i32
    scf.if %47 {
      %c0_20 = arith.constant 0 : index
      %c0_21 = arith.constant 0 : index
      %48 = vector.load %arg6[%c0_20, %c0_21] : memref<1x1xf32, #tpu.memory_space<vmem>>, vector<1x1xf32>
      %cst_22 = arith.constant 5.000000e-01 : f32
      %49 = vector.broadcast %cst_22 : f32 to vector<1x1xf32>
      %50 = arith.mulf %48, %49 : vector<1x1xf32>
      %51 = vector.shape_cast %50 : vector<1x1xf32> to vector<1x1x1xf32>
      %c0_23 = arith.constant 0 : index
      %c0_24 = arith.constant 0 : index
      %c0_25 = arith.constant 0 : index
      %52 = vector.load %arg5[%c0_23, %c0_24, %c0_25] : memref<1x1x1xf32, #tpu.memory_space<vmem>>, vector<1x1x1xf32>
      tpu.vector_store %arg5[%c0_23, %c0_24, %c0_25], %51 {strides = array<i32>} : memref<1x1x1xf32, #tpu.memory_space<vmem>>, vector<1x1x1xf32>,
    } else {
    }
    return
  }
  func.func @transform_0(%arg0: i32, %arg1: i32) -> (i32, i32) {
    %c0_i32 = arith.constant 0 : i32
    %c0_i32_0 = arith.constant 0 : i32
    %c0_i32_1 = arith.constant 0 : i32
    return %c0_i32, %c0_i32_0 : i32, i32
  }
  func.func @transform_1(%arg0: i32, %arg1: i32) -> (i32, i32) {
    %c1_i32 = arith.constant 1 : i32
    %0 = arith.muli %arg0, %c1_i32 : i32
    %1 = arith.addi %0, %arg1 : i32
    %c0_i32 = arith.constant 0 : i32
    %2 = arith.minsi %1, %c0_i32 : i32
    %c0_i32_0 = arith.constant 0 : i32
    %c0_i32_1 = arith.constant 0 : i32
    return %2, %c0_i32_0 : i32, i32
  }
  func.func @transform_2(%arg0: i32, %arg1: i32) -> (i32, i32) {
    %c1_i32 = arith.constant 1 : i32
    %0 = arith.muli %arg0, %c1_i32 : i32
    %1 = arith.addi %0, %arg1 : i32
    %c0_i32 = arith.constant 0 : i32
    %2 = arith.minsi %1, %c0_i32 : i32
    %c0_i32_0 = arith.constant 0 : i32
    %c0_i32_1 = arith.constant 0 : i32
    return %2, %c0_i32_0 : i32, i32
  }
  func.func @transform_3(%arg0: i32, %arg1: i32) -> (i32, i32, i32) {
    %c0_i32 = arith.constant 0 : i32
    %c0_i32_0 = arith.constant 0 : i32
    %c0_i32_1 = arith.constant 0 : i32
    return %arg0, %c0_i32, %c0_i32_0 : i32, i32, i32
  }
}

</mosaic_0001>

<bundles_post_ra>
// kernel: tpu_custom_call.1
= control target key start
LH: loop header
LB: loop body
LE: loop exit
PB: predicated region body
PF: predicated region fallthrough
CT: control target
= control target key end

     0   :  { %8 = vsyncpa [#allocation4], 0  ;;  %s999_s0 = inlined_call_operand.hbm [shape: f32[2,136], index: 0, kind: input, shape index: {}]   ;;  %s1000_s1 = inlined_call_operand.hbm [shape: f32[2,136], index: 1, kind: input, shape index: {}]   ;;  %s1001_s2 = inlined_call_operand.hbm [shape: f32[2,136], index: 2, kind: input, shape index: {}]   ;;  %s1002_s3 = inlined_call_operand.vmem [shape: f32[2,1,1], index: 3, kind: output, shape index: {}]  }
   0x1   :  { %9 = vsyncpa [#allocation6], 0 }
   0x2   :  { %11 = vsyncpa [#allocation6 + $0x1], 0  ;;  %s873_s12 = smov 0   ;;  %s875_s13 = smov 0  }
   0x3   :  { %s877_s14 = smov 0   ;;  %s879_s15 = smov 0  }
   0x4   :  { %s881_s16 = smov 0  }
   0x5 LB: > { %s604_s17 = sadd.s32 4294967295, %s842_s16   ;;  %s29_s18 = sadd.s32 1, %s838_s15  ;;  %s842_s16 = sphi %s881_s16, %s17_s16   ;;  %s838_s15 = sphi %s879_s15, %s1011_s15   ;;  %s834_s14 = sphi %s877_s14, %s1010_s14   ;;  %s830_s13 = sphi %s875_s13, %s989_s13   ;;  %s826_s12 = sphi %s873_s12, %s1009_s12  }
   0x6   : > { %p31_p0 = scmp.ge.s32.totalorder %s29_s18, 2  ;;  %p823_p1 = scmp.ne.s32.totalorder %s830_s13, 0 }
   0x7   : > { %p71_p2 = scmp.eq.s32.totalorder %s842_s16, 0  ;;  %p76_p3 = scmp.ne.s32.totalorder %s830_s13, %s826_s12 }
   0x8   : > { %s1013_s18 = smov (%p31_p0, %s29_s18), 0  ;;  %p905_p4 = scmp.eq.s32.totalorder %s604_s17, 0 }
   0x9   : > { %p909_p5 = por %p823_p1, %p71_p2  ;;  %p606_p7 = scmp.ge.s32.totalorder %s842_s16, 1 }
   0xa   : > { %p915_p6 = por %p905_p4, %p76_p3  ;;  %p145_p8 = scmp.lt.s32.totalorder %s842_s16, 3 }
   0xb   : > { %s844_s23 = smov [#allocation3]  }
   0xc   : > { %s1006_s21 = scalar_select %p915_p6, 1, 0 }
   0xd   : > { %p921_p9 = pnand %p606_p7, %p145_p8  ;;  %s158_s24 = sshll.u32 %s844_s23, 4  ;;  %s159_s24 = int_to_ptr.vmem [resolvable:$true] %s158_s24 }
   0xe   : > { %s720_s25 = scalar_lea.vmem %s159_s24, 64  ;;  %p728_p2 = scmp.lt.s32.totalorder %s159_s24, %s159_s24 }
   0xf   : > { %p646_p10 = pneg %p921_p9  ;;  %p721_p13 = scmp.ne.s32.totalorder %s159_s24, %s720_s25 }
  0x10   : > { %p729_p3 = scmp.lt.s32.totalorder %s720_s25, %s720_s25 }
  0x11   : > { %p647_p11 = pnand %p646_p10, %p905_p4 }
  0x12   : > { %p730_p6 = por %p729_p3, %p728_p2 }
  0x13   : > { %p711_p12 = pneg %p647_p11 }
  0x15   : > { %p723_p0 = pnand %p721_p13, %p711_p12 }
  0x17   : > { %p724_p1 = pneg %p723_p0 }
  0x19   : > { %p731_p7 = pnand %p730_p6, %p724_p1 }
  0x1b   : > { %734 = shalt.err (!%p731_p7)
}
  0x1c   : > { %649 = dma.hbm_to_vmem [thread:$0]  (!%p647_p11), %s999_s0, 64, %s159_s24, [#allocation4]  }
  0x1d   : > { %p608_p8 = scmp.ge.s32.totalorder %s842_s16, 2 }
  0x1f   : > { %165 = sbr.rel (%p608_p8) target bundleno = 82 (0x52), region = 20 }
  0x24   : > { %168 = sbr.rel (!%p909_p5) target bundleno = 59 (0x3b), region = 24  ;;  %s169_s28 = sand.u32 (%p909_p5), 1, %s842_s16  }
  0x25   : > { %s170_s29 = scalar_lea.sflag (%p909_p5), [#allocation6], %s169_s28 }
  0x29   : > { %183 = vsyncadd %s170_s29, 192  ;;  %s845_s30 = smov [#allocation5]   ;;  %s735_s7 = scalar_lea.hbm %s1000_s1, 64 }
  0x2a   : > { %s189_s4 = sshll.u32 %s845_s30, 4  ;;  %p736_p6 = scmp.ne.s32.totalorder %s1000_s1, %s735_s7  ;;  %s190_s4 = int_to_ptr.vmem [resolvable:$true] %s189_s4 }
  0x2b   : > { %p741_p10 = scmp.lt.s32.totalorder %s735_s7, %s735_s7 }
  0x2d   : > { %p743_p11 = pnand %p741_p10, %p736_p6 }
  0x2f   : > { %746 = shalt.err (!%p743_p11)
}
  0x30   : > { %s747_s10 = scalar_lea.vmem %s190_s4, 64  ;;  %s753_s11 = scalar_lea.vmem %s190_s4, 512 }
  0x31   : > { %p748_p12 = scmp.ne.s32.totalorder %s190_s4, %s747_s10  ;;  %p754_p13 = scmp.lt.s32.totalorder %s190_s4, %s190_s4 }
  0x32   : > { %p755_p0 = scmp.lt.s32.totalorder %s753_s11, %s747_s10 }
  0x34   : > { %p756_p1 = por %p755_p0, %p754_p13 }
  0x36   : > { %p757_p2 = pnand %p756_p1, %p748_p12 }
  0x38   : > { %760 = shalt.err (!%p757_p2)
}
  0x39   : > { %s846_s12 = smov 64   ;;  %s847_s23 = smov 4  }
  0x3a   : > { %195 = dma.hbm_to_vmem [thread:$0]  %s1000_s1, 64, %s190_s4, %s170_s29, %s846_s12, %s846_s12, %s847_s23  }
  0x3b PF: > { %198 = sbr.rel (!%p909_p5) target bundleno = 82 (0x52), region = 28  ;;  %s199_s26 = sand.u32 (%p909_p5), 1, %s842_s16  }
  0x3c   : > { %s200_s27 = scalar_lea.sflag (%p909_p5), [#allocation6], %s199_s26 }
  0x40   : > { %213 = vsyncadd %s200_s27, 192  ;;  %s848_s28 = smov [#allocation7]   ;;  %s761_s7 = scalar_lea.hbm %s1001_s2, 64 }
  0x41   : > { %s219_s30 = sshll.u32 %s848_s28, 4  ;;  %p762_p3 = scmp.ne.s32.totalorder %s1001_s2, %s761_s7  ;;  %s220_s30 = int_to_ptr.vmem [resolvable:$true] %s219_s30 }
  0x42   : > { %p767_p7 = scmp.lt.s32.totalorder %s761_s7, %s761_s7 }
  0x44   : > { %p769_p8 = pnand %p767_p7, %p762_p3 }
  0x46   : > { %772 = shalt.err (!%p769_p8)
}
  0x47   : > { %s773_s20 = scalar_lea.vmem %s220_s30, 64  ;;  %s779_s29 = scalar_lea.vmem %s220_s30, 512 }
  0x48   : > { %p774_p5 = scmp.ne.s32.totalorder %s220_s30, %s773_s20  ;;  %p780_p6 = scmp.lt.s32.totalorder %s220_s30, %s220_s30 }
  0x49   : > { %p781_p10 = scmp.lt.s32.totalorder %s779_s29, %s773_s20 }
  0x4b   : > { %p782_p11 = por %p781_p10, %p780_p6 }
  0x4d   : > { %p783_p12 = pnand %p782_p11, %p774_p5 }
  0x4f   : > { %786 = shalt.err (!%p783_p12)
}
  0x50   : > { %s849_s4 = smov 64   ;;  %s850_s10 = smov 4  }
  0x51   : > { %225 = dma.hbm_to_vmem [thread:$0]  %s1001_s2, 64, %s220_s30, %s200_s27, %s849_s4, %s849_s4, %s850_s10  }
  0x52 PF: > { %231 = sbr.rel (%p921_p9) target bundleno = 310 (0x136), region = 32 }
  0x57   : > { %812 = dma.done.wait (%p905_p4), [#allocation4], 64  }
  0x58   : > { %814 = vsyncadd (%p905_p4), [#allocation4], 4294967232  ;;  %s237_s23 = sand.u32 1, %s604_s17   ;;  %s239_s24 = sand.u32 1, %s830_s13  }
  0x59   : > { %s629_s25 = sshll.u32 %s239_s24, 4  ;;  %s238_s26 = scalar_lea.sflag [#allocation6], %s237_s23 }
  0x5a   : > { %s241_s27 = scalar_lea.vmem [#allocation5], %s629_s25  ;;  %p1008_p13 = scmp.ne.s32.totalorder %s1006_s21, 0 }
  0x5c   : > { %816 = dma.done.wait (%p1008_p13), %s238_s26, 512  }
  0x5d   : > { %818 = vsyncadd (%p1008_p13), %s238_s26, 4294966784  ;;  %v327_v0 = vlaneseq  ;;  %v851_v1 = vmov 1983009808   ;;  %s250_s17 = scalar_lea.vmem [#allocation7], %s629_s25  ;;  %v299_v15 = vld [vmem:[%s241_s27] sm:$0xf] }
  0x5e   : > { %v325_v2 = vunpack.c.l.s4 %v851_v1  ;;  %v303_v7 = vld [vmem:[%s250_s17] sm:$0xf]  ;;  %v304_v8 = vld [vmem:[%s250_s17 + $0x4] sm:$0xf]  ;;  %v305_v9 = vld [vmem:[%s250_s17 + $0x8] sm:$0xf] }
  0x5f   : > { %v970_v3 = vshrl.u32 %v327_v0, 7  ;;  %v307_v10 = vld [vmem:[#allocation3] ss:$2 sm:$0x3]  ;;  %v300_v18 = vld [vmem:[%s241_s27 + $0x4] sm:$0xf]  ;;  %v310_v21 = vsub.f32 %v303_v7, %v299_v15 }
  0x60   : > { %v326_v4 = vunpack.c.0.s8 %v325_v2  ;;  %v309_v14 = vld [vmem:[#allocation3 + $0x1] ss:$2 sm:$0x3]  ;;  %v301_v19 = vld [vmem:[%s241_s27 + $0x8] sm:$0xf]  ;;  %v311_v25 = vsub.f32 %v304_v8, %v300_v18  ;;  %vm342_vm0 = vcmask 64512  }
  0x61   : > { %v350_v5 = vsub.s32 0, %v970_v3  ;;  %v354_v6 = vsub.s32 1, %v970_v3  ;;  %v302_v20 = vld [vmem:[%s241_s27 + $0xc] sm:$0xf]  ;;  %v312_v26 = vsub.f32 %v305_v9, %v301_v19  ;;  %v314_v30 = vmul.f32 %v310_v21, %v310_v21  ;;  %s631_s19 = sshll.u32 %s834_s14, 3  ;;  %p290_p4 = scmp.lt.s32.totalorder %s834_s14, 1 }
  0x62   : > { %v329_v11 = vsub.s32 %v326_v4, %v970_v3  ;;  %v306_v22 = vld [vmem:[%s250_s17 + $0xc] sm:$0xf]  ;;  %v315_v33 = vmul.f32 %v311_v25, %v311_v25  ;;  %vm297_vm1 = vcmask 0   ;;  %v485_v19 = vstv %s631_s19 }
  0x63   : > { %v351_v12 = vrot.slane %v307_v10, %v350_v5  ;;  %v355_v13 = vrot.slane %v307_v10, %v354_v6  ;;  %v415_v16 = vrot.slane %v309_v14, %v350_v5  ;;  %v419_v17 = vrot.slane %v309_v14, %v354_v6  ;;  %s1015_s14 = smov (!%p290_p4, %s834_s14), 1 }
  0x64   : > { %v313_v29 = vsub.f32 %v306_v22, %v302_v20  ;;  %v316_v34 = vmul.f32 %v312_v26, %v312_v26  ;;  %v322_v48 = vcombine.low %v314_v30, %v315_v33  ;;  %v486_v20 = vadd.s32 %v485_v19, %v970_v3  ;;  %s292_s28 = scalar_lea.vmem %s1002_s3, %s1015_s14 }
  0x65   : > { %v356_v23 = vcombine.low %v351_v12, %v355_v13  ;;  %v357_v24 = vcombine.high %v351_v12, %v355_v13  ;;  %v420_v27 = vcombine.low %v415_v16, %v419_v17  ;;  %v421_v28 = vcombine.high %v415_v16, %v419_v17 }
  0x66   : > { %v317_v37 = vmul.f32 %v313_v29, %v313_v29  ;;  %v330_v54 = vrot.slane %v322_v48, %v329_v11  ;;  %v852_v12 = vmov 0.0   ;;  %vm487_vm2 = vcmp.lt.s32.totalorder %v486_v20, 2 }
  0x67   : > { %v364_v31 = vrot.slane %v356_v23, %v329_v11  ;;  %v371_v32 = vrot.slane %v357_v24, %v329_v11  ;;  %v428_v35 = vrot.slane %v420_v27, %v329_v11  ;;  %v435_v36 = vrot.slane %v421_v28, %v329_v11  ;;  %298 = vst.msk [vmem:[#allocation2] sm:$0x1] %vm297_vm1, %v852_v12 }
  0x68   : > { %v323_v49 = vcombine.low %v316_v34, %v317_v37 }
  0x69   : > { %v372_v38 = vcombine.high %v364_v31, %v364_v31  ;;  %v373_v39 = vcombine.high %v371_v32, %v371_v32  ;;  %v378_v40 = vmul.f32 %v364_v31, %v303_v7  ;;  %v380_v41 = vmul.f32 %v371_v32, %v305_v9 }
  0x6a   : > { %v436_v42 = vcombine.high %v428_v35, %v428_v35  ;;  %v437_v43 = vcombine.high %v435_v36, %v435_v36  ;;  %v442_v44 = vmul.f32 %v428_v35, %v303_v7  ;;  %v444_v45 = vmul.f32 %v435_v36, %v305_v9 }
  0x6b   : > { %v379_v46 = vmul.f32 %v372_v38, %v304_v8  ;;  %v381_v47 = vmul.f32 %v373_v39, %v306_v22  ;;  %v337_v55 = vrot.slane %v323_v49, %v329_v11 }
  0x6c   : > { %v443_v50 = vmul.f32 %v436_v42, %v304_v8  ;;  %v445_v51 = vmul.f32 %v437_v43, %v306_v22 }
  0x6d   : > { %v386_v52 = vcombine.low %v378_v40, %v379_v46  ;;  %v387_v53 = vcombine.low %v380_v41, %v381_v47  ;;  %v338_v60 = vcombine.low %v330_v54, %v337_v55  ;;  %v339_v61 = vcombine.high %v330_v54, %v337_v55 }
  0x6e   : > { %v450_v56 = vcombine.low %v442_v44, %v443_v50  ;;  %v451_v57 = vcombine.low %v444_v45, %v445_v51  ;;  %v489_v31 = vld [vmem:[#allocation2] sm:$0x1] }
  0x6f   : > { %v394_v58 = vrot.slane %v386_v52, %v329_v11  ;;  %v401_v59 = vrot.slane %v387_v53, %v329_v11  ;;  %v343_v2 = vsel %vm342_vm0, %v339_v61, 0.0 }
  0x70   : > { %v458_v62 = vrot.slane %v450_v56, %v329_v11  ;;  %v465_v63 = vrot.slane %v451_v57, %v329_v11  ;;  %v344_v6 = vadd.f32 %v343_v2, %v338_v60 }
  0x71   : > { %v402_v0 = vcombine.low %v394_v58, %v401_v59  ;;  %v403_v1 = vcombine.high %v394_v58, %v401_v59 }
  0x72   : > { %v466_v4 = vcombine.low %v458_v62, %v465_v63  ;;  %v467_v5 = vcombine.high %v458_v62, %v465_v63  ;;  %345 = vadd.xlane.f32.xlu1 %v344_v6 }
  0x73   : > { %v406_v7 = vsel %vm342_vm0, %v403_v1, 0.0 }
  0x74   : > { %v407_v8 = vadd.f32 %v406_v7, %v402_v0  ;;  %v470_v9 = vsel %vm342_vm0, %v467_v5, 0.0 }
  0x75   : > { %v471_v10 = vadd.f32 %v470_v9, %v466_v4 }
  0x76   : > { %408 = vadd.xlane.f32.xlu0 %v407_v8 }
  0x7a   : > { %472 = vadd.xlane.f32.xlu0 %v471_v10 }
  0xfb   : > { %v346_v21 = vpop.xlane.xlu1 %345 }
  0xff   : > { %v409_v13 = vpop.xlane.xlu0 %408 }
 0x100   : > { %v410_v11 = vmul.f32 0.16666667, %v409_v13 }
 0x102   : > { %v475_v16 = vmul.f32 %v410_v11, %v410_v11 }
 0x103   : > { %v473_v14 = vpop.xlane.xlu0 %472 }
 0x104   : > { %v474_v15 = vmul.f32 0.16666667, %v473_v14 }
 0x106   : > { %v476_v17 = vmul.f32 %v474_v15, %v474_v15 }
 0x108   : > { %v477_v18 = vadd.f32 %v476_v17, %v475_v16 }
 0x10a   : > { %707 = vrsqrt.f32 %v477_v18 }
 0x117   : > { %v708_v22 = vpop.eup %707 }
 0x118   : > { %v479_v23 = vmul.f32 %v708_v22, %v346_v21 }
 0x11a   : > { %v480_v24 = vmul.f32 0.014705882, %v479_v23 }
 0x11c   : > { %v488_v25 = vsel %vm487_vm2, %v480_v24, 0.0 }
 0x11d   : > { %v490_v26 = vrot.slane %v488_v25, 4 }
 0x11f   : > { %v491_v27 = vadd.f32 %v490_v26, %v488_v25 }
 0x121   : > { %v492_v28 = vrot.slane %v491_v27, 2 }
 0x123   : > { %v493_v29 = vadd.f32 %v492_v28, %v491_v27 }
 0x125   : > { %v494_v30 = vrot.slane %v493_v29, 1 }
 0x127   : > { %v495_v32 = vadd.f32 %v494_v30, %v493_v29 }
 0x129   : > { %v496_v33 = vadd.f32 %v495_v32, %v489_v31 }
 0x12b   : > { %498 = vst.msk [vmem:[#allocation2] sm:$0x1] %vm297_vm1, %v496_v33 }
 0x132   : > { %v502_v3 = vld [vmem:[#allocation2] sm:$0x1] }
 0x133   : > { %v503_v34 = vmul.f32 0.5, %v502_v3 }
 0x135   : > { %504 = vst.msk [vmem:[%s292_s28] sm:$0x1] %vm297_vm1, %v503_v34 }
 0x136 PF: > { %s17_s16 = sadd.s32 1, %s842_s16   ;;  %s1009_s12 = smov %s830_s13 }
 0x137   : > { %p14_p9 = scmp.ge.s32.totalorder %s17_s16, 4   ;;  %s989_s13 = smov 0  }
 0x138   : > { %s1010_s14 = smov %s838_s15  ;;  %s1011_s15 = smov %s1013_s18 }
 0x139   :  { %16 = sbr.rel (!%p14_p9) target bundleno = 5 (0x5), region = 97 }
 0x13e   :  { %522 = vsyncpa [#allocation4], 1 }
 0x13f   :  { %524 = vsyncpa [#allocation4 + $0x1], 1 }
 0x140   :  { %525 = vsyncpa [#allocation6], 1 }
 0x141   :  { %527 = vsyncpa [#allocation6 + $0x1], 1 }

</bundles_post_ra>
